<compile_context>
chip_gen: v7x
topology: tpu7x:2x2x1
jax: 0.10.0
libtpu: 0.0.40
codegen_flags: <defaults>
</compile_context>

<pallas_src>
import functools

import jax
import jax.numpy as jnp
from jax.experimental import pallas as pl
from jax.experimental.pallas import tpu as pltpu

DIM_DISC = 3
DIM_CONTI = 2
C_IN = 1024
C_HID = 128
NOUT = DIM_DISC + 2 * DIM_CONTI      # 7 useful output columns (disc|mu|logvar)
NOUT_PAD = 8                         # narrow output width (== full last dim of out array)
TM_DEFAULT = 2048                    # rows per grid step


def _round_up(x, m):
    return (x + m - 1) // m * m


def _choose_tm(m, tm):
    """Pick a (8-aligned) row-tile size; split small M so the grid has >=2 steps."""
    m8 = _round_up(max(m, 1), 8)
    tm = max(_round_up(max(tm, 1), 8), 8)
    if m8 <= tm:
        # Fits in one tile: split into two grid steps when possible so both
        # v7x TensorCores get work (M axis is marked "parallel").
        if m8 > 8:
            return _round_up(pl.cdiv(m8, 2), 8)
        return m8
    return tm


def q_kernel(x_ref, w_ref, b_ref, out_ref):
    # x_ref : (TM, 1024) bf16   streamed input tile
    # w_ref : (1024, 8)  bf16   VMEM-resident folded weight (w1 @ heads, zero-padded)
    # b_ref : (1, 8)     f32    VMEM-resident folded bias
    # out_ref: (TM, 8)   f32    cols [0:3]=disc, [3:5]=mu, [5:7]=var (exp applied)
    z = jnp.dot(x_ref[...], w_ref[...], preferred_element_type=jnp.float32) + b_ref[...]
    col = jax.lax.broadcasted_iota(jnp.int32, z.shape, dimension=1)
    is_var = (col >= DIM_DISC + DIM_CONTI) & (col < NOUT)
    out_ref[...] = jnp.where(is_var, jnp.exp(z), z)


def _pack_heads(params):
    """Fold the 1024->128 conv and the three 128->k heads into one (1024, 8) weight."""
    w1, wd, bd, wm, bm, wv, bv = params
    wh = jnp.zeros((C_HID, NOUT_PAD), jnp.float32)
    wh = wh.at[:, 0:DIM_DISC].set(wd)
    wh = wh.at[:, DIM_DISC:DIM_DISC + DIM_CONTI].set(wm)
    wh = wh.at[:, DIM_DISC + DIM_CONTI:NOUT].set(wv)
    bh = jnp.zeros((1, NOUT_PAD), jnp.float32)
    bh = bh.at[:, 0:DIM_DISC].set(bd)
    bh = bh.at[:, DIM_DISC:DIM_DISC + DIM_CONTI].set(bm)
    bh = bh.at[:, DIM_DISC + DIM_CONTI:NOUT].set(bv)
    wc = w1 @ wh                       # fold in f32, quantize to bf16 once
    return wc.astype(jnp.bfloat16), bh


@functools.partial(jax.jit, static_argnames=("tm",))
def q_forward(x_ncl, params, tm=TM_DEFAULT):
    """x_ncl: (N, 1024, L) float32, matching PyTorch Conv1d NCL layout."""
    N, C, L = x_ncl.shape
    assert C == C_IN
    M = N * L

    wc_bf16, bh = _pack_heads(params)

    # channels-last 2D (M, C_in); the bf16 cast fuses into this transpose/reshape,
    # halving the kernel's dominant HBM read. For L == 1 the reshape is free.
    # TODO(synk): for L > 1, grid over (N, L-tiles) and read (1, C_IN, tl) NCL
    # blocks directly (contract C with dot_general) to remove this transpose.
    x2 = jnp.transpose(x_ncl, (0, 2, 1)).reshape(M, C).astype(jnp.bfloat16)

    tm_eff = _choose_tm(M, tm)
    m_pad = _round_up(max(M, 1), tm_eff)
    x_p = jnp.pad(x2, ((0, m_pad - M), (0, 0))) if m_pad != M else x2

    # Double-buffered x + out tiles, resident folded weights, plus headroom;
    # capped at 48 MiB so it stays safe on v7x's 64 MiB VMEM.
    vmem_want = (2 * tm_eff * C_IN * 2          # x tiles (bf16)
                 + 2 * tm_eff * NOUT_PAD * 4    # out tiles (f32)
                 + 2 * (C_IN * NOUT_PAD * 2 + NOUT_PAD * 4)
                 + (2 << 20))
    vmem_limit = int(min(max(vmem_want, 16 << 20), 48 << 20))

    # TODO(synk): for the tiny-M (batch~2, L=1) regime the call is dominated by
    # weight DMA + launch overhead; keep weights VMEM-resident across calls
    # (cross-call prefetch) or use fp8 weights on v7x to move that floor.
    out = pl.pallas_call(
        q_kernel,
        out_shape=jax.ShapeDtypeStruct((m_pad, NOUT_PAD), jnp.float32),
        grid_spec=pltpu.PrefetchScalarGridSpec(
            num_scalar_prefetch=0,
            grid=(m_pad // tm_eff,),
            in_specs=[
                pl.BlockSpec((tm_eff, C_IN), lambda i: (i, 0)),      # streamed x tile (bf16)
                pl.BlockSpec((C_IN, NOUT_PAD), lambda i: (0, 0)),    # resident folded weight
                pl.BlockSpec((1, NOUT_PAD), lambda i: (0, 0)),       # resident folded bias
            ],
            out_specs=pl.BlockSpec((tm_eff, NOUT_PAD), lambda i: (i, 0)),
        ),
        compiler_params=pltpu.CompilerParams(
            dimension_semantics=("parallel",),
            vmem_limit_bytes=vmem_limit),
    )(x_p, wc_bf16, bh)

    z = out[:M, :NOUT]

    def to_ncl(o):
        return jnp.transpose(o.reshape(N, L, -1), (0, 2, 1))

    disc = jnp.squeeze(to_ncl(z[:, 0:DIM_DISC])) if DIM_DISC > 0 else None
    mu = jnp.squeeze(to_ncl(z[:, DIM_DISC:DIM_DISC + DIM_CONTI]))
    var = jnp.squeeze(to_ncl(z[:, DIM_DISC + DIM_CONTI:NOUT]))
    return disc, mu, var


def init_params(key):
    k1, k2, k3, k4, k5, k6, k7 = jax.random.split(key, 7)
    # PyTorch conv weights are (Cout, Cin, 1); we store transposed (Cin, Cout).
    w1 = jax.random.normal(k1, (C_IN, C_HID), jnp.float32) * 0.02
    wd = jax.random.normal(k2, (C_HID, DIM_DISC), jnp.float32) * 0.05
    bd = jax.random.normal(k3, (1, DIM_DISC), jnp.float32) * 0.05
    wm = jax.random.normal(k4, (C_HID, DIM_CONTI), jnp.float32) * 0.05
    bm = jax.random.normal(k5, (1, DIM_CONTI), jnp.float32) * 0.05
    wv = jax.random.normal(k6, (C_HID, DIM_CONTI), jnp.float32) * 0.05
    bv = jax.random.normal(k7, (1, DIM_CONTI), jnp.float32) * 0.05
    return (w1, wd, bd, wm, bm, wv, bv)


def q_forward_ref(x_ncl, params, match_kernel_precision=True):
    """Plain-JAX reference. match_kernel_precision=True mirrors the kernel's
    f32 weight fold + bf16 quantization; False is the pure-f32 PyTorch math."""
    w1, wd, bd, wm, bm, wv, bv = params
    N, C, L = x_ncl.shape
    x2 = jnp.transpose(x_ncl, (0, 2, 1)).reshape(N * L, C)
    if match_kernel_precision:
        wh = jnp.concatenate([wd, wm, wv], axis=1)            # (128, 7)
        bhc = jnp.concatenate([bd, bm, bv], axis=1)            # (1, 7)
        wc = (w1 @ wh).astype(jnp.bfloat16)
        z = jnp.dot(x2.astype(jnp.bfloat16), wc,
                    preferred_element_type=jnp.float32) + bhc
    else:
        y = x2 @ w1
        z = jnp.concatenate([y @ wd + bd, y @ wm + bm, y @ wv + bv], axis=1)
    disc = z[:, 0:DIM_DISC]
    mu = z[:, DIM_DISC:DIM_DISC + DIM_CONTI]
    var = jnp.exp(z[:, DIM_DISC + DIM_CONTI:NOUT])

    def to_ncl(o):
        return jnp.transpose(o.reshape(N, L, -1), (0, 2, 1))

    return (jnp.squeeze(to_ncl(disc)), jnp.squeeze(to_ncl(mu)),
            jnp.squeeze(to_ncl(var)))


if __name__ == "__main__":
    key = jax.random.PRNGKey(0)
    kx, kp = jax.random.split(key)
    params = init_params(kp)

    # Typical InfoGAN usage: (batch, 1024, 1)
    N, L = 2, 1
    x = jax.random.normal(kx, (N, C_IN, L), jnp.float32)

    disc, mu, var = jax.block_until_ready(q_forward(x, params))
    disc_r, mu_r, var_r = q_forward_ref(x, params, match_kernel_precision=True)
    disc_f, mu_f, var_f = q_forward_ref(x, params, match_kernel_precision=False)

    assert disc.shape == (N, DIM_DISC) and mu.shape == (N, DIM_CONTI) and var.shape == (N, DIM_CONTI)
    for a, b in ((disc, disc_r), (mu, mu_r), (var, var_r)):
        assert jnp.allclose(a, b, atol=3e-3, rtol=3e-3)       # vs precision-matched ref
    for a, b in ((disc, disc_f), (mu, mu_f), (var, var_f)):
        assert jnp.allclose(a, b, atol=6e-2, rtol=6e-2)       # vs pure-f32 ref
    assert jnp.all(var > 0)

    # Exercise the multi-tile grid + row-padding path (M=65 -> 3 grid steps at tm=32),
    # including a non-multiple-of-8 user tm that gets rounded up.
    N2, L2 = 5, 13
    x_big = jax.random.normal(jax.random.PRNGKey(1), (N2, C_IN, L2), jnp.float32)
    d2, m2, v2 = jax.block_until_ready(q_forward(x_big, params, tm=30))
    d2r, m2r, v2r = q_forward_ref(x_big, params, match_kernel_precision=True)
    assert d2.shape == (N2, DIM_DISC, L2) and m2.shape == (N2, DIM_CONTI, L2)
    for a, b in ((d2, d2r), (m2, m2r), (v2, v2r)):
        assert jnp.allclose(a, b, atol=3e-3, rtol=3e-3)
    assert jnp.all(v2 > 0)

    print("KERNEL_OK")
</pallas_src>

<mosaic_0001>
module attributes {stable_mosaic.version = 11 : i64} {
  func.func @q_kernel(%arg0: i32, %arg1: memref<8x1024xbf16, #tpu.memory_space<vmem>>, %arg2: memref<1024x8xbf16, #tpu.memory_space<vmem>>, %arg3: memref<1x8xf32, #tpu.memory_space<vmem>>, %arg4: memref<8x8xf32, #tpu.memory_space<vmem>>) attributes {dimension_semantics = [#tpu.dimension_semantics<parallel>], iteration_bounds = array<i64: 1>, scalar_prefetch = 0 : i64, scratch_operands = 0 : i64, tpu.core_type = #tpu.core_type<tc>, window_params = [{transform_indices = @transform_0, window_bounds = array<i64: 8, 1024>}, {pipeline_mode = #tpu.pipeline_mode<synchronous>, transform_indices = @transform_1, window_bounds = array<i64: 1024, 8>}, {pipeline_mode = #tpu.pipeline_mode<synchronous>, transform_indices = @transform_2, window_bounds = array<i64: 1, 8>}, {transform_indices = @transform_3, window_bounds = array<i64: 8, 8>}]} {
    %c0 = arith.constant 0 : index
    %c0_0 = arith.constant 0 : index
    %0 = vector.load %arg1[%c0, %c0_0] : memref<8x1024xbf16, #tpu.memory_space<vmem>>, vector<8x1024xbf16>
    %c0_1 = arith.constant 0 : index
    %c0_2 = arith.constant 0 : index
    %1 = vector.load %arg2[%c0_1, %c0_2] : memref<1024x8xbf16, #tpu.memory_space<vmem>>, vector<1024x8xbf16>
    %cst = arith.constant dense<0.000000e+00> : vector<8x8xf32>
    %2 = tpu.matmul %0, %1, %cst {dimension_numbers = #tpu.dot_dimension_numbers<[1], [0], [0], [1], [0, 0, 1, 1], [], []>} : vector<8x1024xbf16>, vector<1024x8xbf16>, vector<8x8xf32> -> vector<8x8xf32>
    %c0_3 = arith.constant 0 : index
    %c0_4 = arith.constant 0 : index
    %3 = vector.load %arg3[%c0_3, %c0_4] : memref<1x8xf32, #tpu.memory_space<vmem>>, vector<1x8xf32>
    %4 = vector.broadcast %3 : vector<1x8xf32> to vector<8x8xf32>
    %5 = arith.addf %2, %4 : vector<8x8xf32>
    %6 = tpu.iota {dimensions = array<i32: 1>} : vector<8x8xi32>
    %c5_i32 = arith.constant 5 : i32
    %7 = vector.broadcast %c5_i32 : i32 to vector<8x8xi32>
    %8 = arith.cmpi sge, %6, %7 : vector<8x8xi32>
    %c7_i32 = arith.constant 7 : i32
    %9 = vector.broadcast %c7_i32 : i32 to vector<8x8xi32>
    %10 = arith.cmpi slt, %6, %9 : vector<8x8xi32>
    %11 = arith.andi %8, %10 : vector<8x8xi1>
    %12 = math.exp %5 : vector<8x8xf32>
    %13 = arith.select %11, %12, %5 : vector<8x8xi1>, vector<8x8xf32>
    %c0_5 = arith.constant 0 : index
    %c0_6 = arith.constant 0 : index
    %14 = vector.load %arg4[%c0_5, %c0_6] : memref<8x8xf32, #tpu.memory_space<vmem>>, vector<8x8xf32>
    tpu.vector_store %arg4[%c0_5, %c0_6], %13 {strides = array<i32>} : memref<8x8xf32, #tpu.memory_space<vmem>>, vector<8x8xf32>,
    return
  }
  func.func @transform_0(%arg0: i32) -> (i32, i32) {
    %c0_i32 = arith.constant 0 : i32
    %c0_i32_0 = arith.constant 0 : i32
    return %arg0, %c0_i32 : i32, i32
  }
  func.func @transform_1(%arg0: i32) -> (i32, i32) {
    %c0_i32 = arith.constant 0 : i32
    %c0_i32_0 = arith.constant 0 : i32
    %c0_i32_1 = arith.constant 0 : i32
    return %c0_i32, %c0_i32_0 : i32, i32
  }
  func.func @transform_2(%arg0: i32) -> (i32, i32) {
    %c0_i32 = arith.constant 0 : i32
    %c0_i32_0 = arith.constant 0 : i32
    %c0_i32_1 = arith.constant 0 : i32
    return %c0_i32, %c0_i32_0 : i32, i32
  }
  func.func @transform_3(%arg0: i32) -> (i32, i32) {
    %c0_i32 = arith.constant 0 : i32
    %c0_i32_0 = arith.constant 0 : i32
    return %arg0, %c0_i32 : i32, i32
  }
}

</mosaic_0001>

<bundles_post_ra>
// kernel: q_forward.1
= control target key start
LH: loop header
LB: loop body
LE: loop exit
PB: predicated region body
PF: predicated region fallthrough
CT: control target
= control target key end

     0   :  { %vm734_vm3 = vcmask 64512   ;;  %s1205_s1 = inlined_call_operand.vmem [shape: bf16[1024,8], index: 1, kind: input, shape index: {}]   ;;  %s1206_s0 = inlined_call_operand.vmem [shape: bf16[8,1024], index: 0, kind: input, shape index: {}]   ;;  %s1207_s2 = inlined_call_operand.vmem [shape: f32[1,8], index: 2, kind: input, shape index: {}]   ;;  %s1208_s3 = inlined_call_operand.vmem [shape: f32[8,8], index: 3, kind: output, shape index: {}]  }
   0x1   :  { %v901_v0 = vld [vmem:[%s1205_s1 + $0x40] sm:$0xff]   ;;  %v905_v4 = vld [vmem:[%s1205_s1 + $0x48] sm:$0xff]   ;;  %v909_v8 = vld [vmem:[%s1205_s1 + $0x50] sm:$0xff]  }
   0x2   :  { %v902_v1 = vld [vmem:[%s1205_s1 + $0xc0] sm:$0xff]   ;;  %813 = vmatprep.subr.bf16.mxu0 %v901_v0  ;;  %v906_v5 = vld [vmem:[%s1205_s1 + $0xc8] sm:$0xff]   ;;  %v910_v9 = vld [vmem:[%s1205_s1 + $0xd0] sm:$0xff]  }
   0x3   :  { %v903_v2 = vld [vmem:[%s1205_s1] sm:$0xff]   ;;  %835 = vmatprep.subr.bf16.mxu1 %v902_v1  ;;  %v907_v6 = vld [vmem:[%s1205_s1 + $0x8] sm:$0xff]   ;;  %v911_v10 = vld [vmem:[%s1205_s1 + $0x10] sm:$0xff]  }
   0x4   :  { %v904_v3 = vld [vmem:[%s1205_s1 + $0x80] sm:$0xff]   ;;  %814 = vmatpush3.bf16.msra.mxu0 %v903_v2  ;;  %v908_v7 = vld [vmem:[%s1205_s1 + $0x88] sm:$0xff]   ;;  %v912_v11 = vld [vmem:[%s1205_s1 + $0x90] sm:$0xff]  }
   0x5   :  { %836 = vmatpush3.bf16.msra.mxu1 %v904_v3  ;;  %815 = vmatprep.subr.bf16.mxu0 %v905_v4  ;;  %v913_v12 = vld [vmem:[%s1205_s1 + $0x58] sm:$0xff]   ;;  %v917_v16 = vld [vmem:[%s1205_s1 + $0x60] sm:$0xff]   ;;  %v921_v20 = vld [vmem:[%s1205_s1 + $0x68] sm:$0xff]  }
   0x6   :  { %837 = vmatprep.subr.bf16.mxu1 %v906_v5  ;;  %v914_v13 = vld [vmem:[%s1205_s1 + $0xd8] sm:$0xff]   ;;  %v918_v17 = vld [vmem:[%s1205_s1 + $0xe0] sm:$0xff]   ;;  %v922_v21 = vld [vmem:[%s1205_s1 + $0xe8] sm:$0xff]  }
   0x7   :  { %v915_v14 = vld [vmem:[%s1205_s1 + $0x18] sm:$0xff]   ;;  %v919_v18 = vld [vmem:[%s1205_s1 + $0x20] sm:$0xff]   ;;  %v923_v22 = vld [vmem:[%s1205_s1 + $0x28] sm:$0xff]  }
   0x8   :  { %816 = vmatpush3.bf16.msra.mxu0 %v907_v6  ;;  %v916_v15 = vld [vmem:[%s1205_s1 + $0x98] sm:$0xff]   ;;  %v920_v19 = vld [vmem:[%s1205_s1 + $0xa0] sm:$0xff]   ;;  %v924_v23 = vld [vmem:[%s1205_s1 + $0xa8] sm:$0xff]  }
   0x9   :  { %838 = vmatpush3.bf16.msra.mxu1 %v908_v7  ;;  %817 = vmatprep.subr.bf16.mxu0 %v909_v8  ;;  %v925_v24 = vld [vmem:[%s1205_s1 + $0x70] sm:$0xff]   ;;  %v929_v28 = vld [vmem:[%s1205_s1 + $0x78] sm:$0xff]   ;;  %v15_v32 = vld [vmem:[%s1206_s0] sm:$0xff] }
   0xa   :  { %839 = vmatprep.subr.bf16.mxu1 %v910_v9  ;;  %v926_v25 = vld [vmem:[%s1205_s1 + $0xf0] sm:$0xff]   ;;  %v930_v29 = vld [vmem:[%s1205_s1 + $0xf8] sm:$0xff]   ;;  %v16_v33 = vld [vmem:[%s1206_s0 + $0x8] sm:$0xff]  ;;  %v741_v34 = vcombine.low %v15_v32, %v15_v32  ;;  %v742_v35 = vcombine.high %v15_v32, %v15_v32 }
   0xb   :  { %v927_v26 = vld [vmem:[%s1205_s1 + $0x30] sm:$0xff]   ;;  %v931_v30 = vld [vmem:[%s1205_s1 + $0x38] sm:$0xff]   ;;  %v743_v36 = vcombine.low %v16_v33, %v16_v33  ;;  %v744_v37 = vcombine.high %v16_v33, %v16_v33  ;;  %v937_v38 = vld [vmem:[%s1205_s1 + $0x140] sm:$0xff]  }
   0xc   :  { %818 = vmatpush3.bf16.msra.mxu0 %v911_v10  ;;  %v928_v27 = vld [vmem:[%s1205_s1 + $0xb0] sm:$0xff]   ;;  %v932_v31 = vld [vmem:[%s1205_s1 + $0xb8] sm:$0xff]   ;;  %v938_v39 = vld [vmem:[%s1205_s1 + $0x1c0] sm:$0xff]   ;;  %598 = vmatprep.mubr.bf16.mxu0 %v742_v35 }
   0xd   :  { %840 = vmatpush3.bf16.msra.mxu1 %v912_v11  ;;  %819 = vmatprep.subr.bf16.mxu0 %v913_v12  ;;  %v939_v40 = vld [vmem:[%s1205_s1 + $0x100] sm:$0xff]   ;;  %v941_v42 = vld [vmem:[%s1205_s1 + $0x148] sm:$0xff]   ;;  %v945_v46 = vld [vmem:[%s1205_s1 + $0x150] sm:$0xff]  }
   0xe   :  { %841 = vmatprep.subr.bf16.mxu1 %v914_v13  ;;  %638 = vmatprep.mubr.bf16.mxu1 %v744_v37  ;;  %v940_v41 = vld [vmem:[%s1205_s1 + $0x180] sm:$0xff]   ;;  %v942_v43 = vld [vmem:[%s1205_s1 + $0x1c8] sm:$0xff]   ;;  %v946_v47 = vld [vmem:[%s1205_s1 + $0x1d0] sm:$0xff]   ;;  %v726_v37 = vlaneseq }
   0xf   :  { %v943_v44 = vld [vmem:[%s1205_s1 + $0x108] sm:$0xff]   ;;  %v947_v48 = vld [vmem:[%s1205_s1 + $0x110] sm:$0xff]   ;;  %v949_v50 = vld [vmem:[%s1205_s1 + $0x158] sm:$0xff]  }
  0x10   :  { %820 = vmatpush3.bf16.msra.mxu0 %v915_v14  ;;  %v944_v45 = vld [vmem:[%s1205_s1 + $0x188] sm:$0xff]   ;;  %v948_v49 = vld [vmem:[%s1205_s1 + $0x190] sm:$0xff]   ;;  %v950_v51 = vld [vmem:[%s1205_s1 + $0x1d8] sm:$0xff]  }
  0x11   :  { %842 = vmatpush3.bf16.msra.mxu1 %v916_v15  ;;  %821 = vmatprep.subr.bf16.mxu0 %v917_v16  ;;  %v951_v52 = vld [vmem:[%s1205_s1 + $0x118] sm:$0xff]   ;;  %v953_v54 = vld [vmem:[%s1205_s1 + $0x160] sm:$0xff]   ;;  %v957_v58 = vld [vmem:[%s1205_s1 + $0x168] sm:$0xff]  }
  0x12   :  { %843 = vmatprep.subr.bf16.mxu1 %v918_v17  ;;  %v952_v53 = vld [vmem:[%s1205_s1 + $0x198] sm:$0xff]   ;;  %v954_v55 = vld [vmem:[%s1205_s1 + $0x1e0] sm:$0xff]   ;;  %v958_v59 = vld [vmem:[%s1205_s1 + $0x1e8] sm:$0xff]  }
  0x13   :  { %v955_v56 = vld [vmem:[%s1205_s1 + $0x120] sm:$0xff]   ;;  %v959_v60 = vld [vmem:[%s1205_s1 + $0x128] sm:$0xff]   ;;  %v961_v62 = vld [vmem:[%s1205_s1 + $0x170] sm:$0xff]  }
  0x14   :  { %822 = vmatpush3.bf16.msra.mxu0 %v919_v18  ;;  %v956_v57 = vld [vmem:[%s1205_s1 + $0x1a0] sm:$0xff]   ;;  %v960_v61 = vld [vmem:[%s1205_s1 + $0x1a8] sm:$0xff]   ;;  %v962_v63 = vld [vmem:[%s1205_s1 + $0x1f0] sm:$0xff]  }
  0x15   :  { %844 = vmatpush3.bf16.msra.mxu1 %v920_v19  ;;  %823 = vmatprep.subr.bf16.mxu0 %v921_v20  ;;  %v963_v0 = vld [vmem:[%s1205_s1 + $0x130] sm:$0xff]   ;;  %v965_v2 = vld [vmem:[%s1205_s1 + $0x178] sm:$0xff]   ;;  %v740_v14 = vld [vmem:[%s1207_s2] ss:$0 sm:$0xff] }
  0x16   :  { %845 = vmatprep.subr.bf16.mxu1 %v922_v21  ;;  %v964_v1 = vld [vmem:[%s1205_s1 + $0x1b0] sm:$0xff]   ;;  %v966_v3 = vld [vmem:[%s1205_s1 + $0x1f8] sm:$0xff]  }
  0x17   :  { %v967_v4 = vld [vmem:[%s1205_s1 + $0x138] sm:$0xff]   ;;  %v17_v6 = vld [vmem:[%s1206_s0 + $0x10] sm:$0xff] }
  0x18   :  { %824 = vmatpush3.bf16.msra.mxu0 %v923_v22  ;;  %v968_v5 = vld [vmem:[%s1205_s1 + $0x1b8] sm:$0xff]   ;;  %v745_v7 = vcombine.low %v17_v6, %v17_v6  ;;  %v746_v8 = vcombine.high %v17_v6, %v17_v6 }
  0x19   :  { %846 = vmatpush3.bf16.msra.mxu1 %v924_v23  ;;  %825 = vmatprep.subr.bf16.mxu0 %v925_v24  ;;  %v18_v9 = vld [vmem:[%s1206_s0 + $0x18] sm:$0xff] }
  0x1a   :  { %847 = vmatprep.subr.bf16.mxu1 %v926_v25  ;;  %v747_v10 = vcombine.low %v18_v9, %v18_v9  ;;  %v748_v11 = vcombine.high %v18_v9, %v18_v9 }
  0x1c   :  { %826 = vmatpush3.bf16.msra.mxu0 %v927_v26 }
  0x1d   :  { %848 = vmatpush3.bf16.msra.mxu1 %v928_v27  ;;  %827 = vmatprep.subr.bf16.mxu0 %v929_v28 }
  0x1e   :  { %849 = vmatprep.subr.bf16.mxu1 %v930_v29 }
  0x20   :  { %828 = vmatpush3.bf16.msra.mxu0 %v931_v30 }
  0x21   :  { %850 = vmatpush3.bf16.msra.mxu1 %v932_v31  ;;  %857 = vmatprep.subr.bf16.mxu0 %v937_v38 }
  0x22   :  { %879 = vmatprep.subr.bf16.mxu1 %v938_v39  ;;  %v727_v39 = vand.u32 127, %v726_v37 }
  0x23   :  { %599 = vmatmul.mubr.bf16.vlgmr.msra.gmra.mrb[0].mxu0 %v741_v34 }
  0x24   :  { %639 = vmatmul.mubr.bf16.vlgmr.msra.gmra.mrb[0].mxu1 %v743_v36  ;;  %858 = vmatpush3.bf16.msra.mxu0 %v939_v40  ;;  %vm728_vm0 = vcmp.ge.s32.totalorder %v727_v39, 5  ;;  %vm729_vm1 = vcmp.lt.s32.totalorder %v727_v39, 7 }
  0x25   :  { %880 = vmatpush3.bf16.msra.mxu1 %v940_v41  ;;  %859 = vmatprep.subr.bf16.mxu0 %v941_v42  ;;  %vm730_vm2 = vmand %vm728_vm0, %vm729_vm1 }
  0x26   :  { %881 = vmatprep.subr.bf16.mxu1 %v942_v43  ;;  %678 = vmatprep.mubr.bf16.mxu0 %v746_v8 }
  0x27   :  { %718 = vmatprep.mubr.bf16.mxu1 %v748_v11 }
  0x28   :  { %860 = vmatpush3.bf16.msra.mxu0 %v943_v44 }
  0x29   :  { %882 = vmatpush3.bf16.msra.mxu1 %v944_v45  ;;  %861 = vmatprep.subr.bf16.mxu0 %v945_v46 }
  0x2a   :  { %883 = vmatprep.subr.bf16.mxu1 %v946_v47 }
  0x2c   :  { %862 = vmatpush3.bf16.msra.mxu0 %v947_v48 }
  0x2d   :  { %884 = vmatpush3.bf16.msra.mxu1 %v948_v49  ;;  %863 = vmatprep.subr.bf16.mxu0 %v949_v50 }
  0x2e   :  { %885 = vmatprep.subr.bf16.mxu1 %v950_v51 }
  0x30   :  { %864 = vmatpush3.bf16.msra.mxu0 %v951_v52 }
  0x31   :  { %886 = vmatpush3.bf16.msra.mxu1 %v952_v53  ;;  %865 = vmatprep.subr.bf16.mxu0 %v953_v54 }
  0x32   :  { %887 = vmatprep.subr.bf16.mxu1 %v954_v55 }
  0x34   :  { %866 = vmatpush3.bf16.msra.mxu0 %v955_v56 }
  0x35   :  { %888 = vmatpush3.bf16.msra.mxu1 %v956_v57  ;;  %867 = vmatprep.subr.bf16.mxu0 %v957_v58 }
  0x36   :  { %889 = vmatprep.subr.bf16.mxu1 %v958_v59 }
  0x38   :  { %868 = vmatpush3.bf16.msra.mxu0 %v959_v60 }
  0x39   :  { %890 = vmatpush3.bf16.msra.mxu1 %v960_v61  ;;  %869 = vmatprep.subr.bf16.mxu0 %v961_v62 }
  0x3a   :  { %891 = vmatprep.subr.bf16.mxu1 %v962_v63 }
  0x3c   :  { %870 = vmatpush3.bf16.msra.mxu0 %v963_v0 }
  0x3d   :  { %892 = vmatpush3.bf16.msra.mxu1 %v964_v1  ;;  %871 = vmatprep.subr.bf16.mxu0 %v965_v2 }
  0x3e   :  { %893 = vmatprep.subr.bf16.mxu1 %v966_v3 }
  0x40   :  { %872 = vmatpush3.bf16.msra.mxu0 %v967_v4 }
  0x41   :  { %894 = vmatpush3.bf16.msra.mxu1 %v968_v5 }
  0x43   :  { %679 = vmatmul.mubr.bf16.vlgmr.msra.gmra.mrb[4].mxu0 %v745_v7 }
  0x44   :  { %719 = vmatmul.mubr.bf16.vlgmr.msra.gmra.mrb[4].mxu1 %v747_v10 }
  0xf6   :  { %v829_v12 = vpop.f32.mrb[0].mxu0 }
  0xf7   :  { %v851_v13 = vpop.f32.mrb[0].mxu1  ;;  %v830_v15 = vpop.f32.mrb[1].mxu0 }
  0xf8   :  { %v852_v16 = vpop.f32.mrb[1].mxu1  ;;  %v831_v17 = vadd.f32 %v830_v15, %v829_v12  ;;  %v832_v19 = vpop.f32.mrb[2].mxu0 }
  0xf9   :  { %v853_v18 = vadd.f32 %v852_v16, %v851_v13  ;;  %v854_v20 = vpop.f32.mrb[2].mxu1  ;;  %v833_v21 = vpop.f32.mrb[3].mxu0 }
  0xfa   :  { %v855_v22 = vpop.f32.mrb[3].mxu1  ;;  %v601_v23 = vadd.f32 %v831_v17, %v740_v14 }
  0xfc   :  { %v641_v24 = vadd.f32 %v853_v18, %v601_v23 }
 0x116   :  { %v873_v25 = vpop.f32.mrb[4].mxu0 }
 0x117   :  { %v895_v26 = vpop.f32.mrb[4].mxu1  ;;  %v874_v27 = vpop.f32.mrb[5].mxu0 }
 0x118   :  { %v896_v28 = vpop.f32.mrb[5].mxu1  ;;  %v875_v29 = vadd.f32 %v874_v27, %v873_v25  ;;  %v876_v31 = vpop.f32.mrb[6].mxu0 }
 0x119   :  { %v897_v30 = vadd.f32 %v896_v28, %v895_v26  ;;  %v898_v32 = vpop.f32.mrb[6].mxu1  ;;  %v877_v33 = vpop.f32.mrb[7].mxu0 }
 0x11a   :  { %v899_v34 = vpop.f32.mrb[7].mxu1  ;;  %v681_v35 = vadd.f32 %v875_v29, %v641_v24 }
 0x11c   :  { %v721_v36 = vadd.f32 %v897_v30, %v681_v35 }
 0x11e   :  { %v731_v38 = vmul.f32 1.442695, %v721_v36 }
 0x120   :  { %973 = vpow2.f32 %v731_v38 }
 0x12a   :  { %v974_v40 = vpop.eup %973 }
 0x12b   :  { %v733_v41 = vsel %vm730_vm2, %v974_v40, %v721_v36 }
 0x12c   :  { %735 = vst.msk [vmem:[%s1208_s3] sm:$0xff] %vm734_vm3, %v733_v41 }

</bundles_post_ra>
